<compile_context>
chip_gen: v7x
topology: tpu7x:2x2x1
jax: 0.10.0
libtpu: 0.0.40
codegen_flags: <defaults>
</compile_context>

<pallas_src>
import functools
import math

import jax
import jax.numpy as jnp
from jax import lax
from jax.experimental import pallas as pl
from jax.experimental.pallas import tpu as pltpu


def _conv2d_bias_kernel(x_ref, w_ref, b_ref, o_ref, *,
                        TH, KH, stride, dilation, wp_cin, n_t):
    """x_ref: (Hp, Wp*Cin) padded sample, w_ref: (KH, Wp*Cin, OW*Cout),
    b_ref: (1, OW*Cout), o_ref: (TH, OW*Cout)."""
    th_in = (TH - 1) * stride + dilation * (KH - 1) + 1

    if n_t == 1:
        # Single row tile per sample: static window, no dynamic-slice address math.
        xwin = x_ref[:th_in, :]                               # (th_in, Wp*Cin)
    else:
        t = pl.program_id(1)
        row0 = pl.multiple_of(t * (TH * stride), TH * stride)
        xwin = x_ref[pl.ds(row0, th_in), :]                   # (th_in, Wp*Cin)

    acc = None
    for kh in range(KH):
        rows = lax.slice(
            xwin,
            (kh * dilation, 0),
            (kh * dilation + (TH - 1) * stride + 1, wp_cin),
            (stride, 1),
        )                                                     # (TH, Wp*Cin)
        d = jnp.dot(rows, w_ref[kh], preferred_element_type=jnp.float32)
        acc = d if acc is None else acc + d                   # (TH, OW*Cout)

    acc = acc + b_ref[...]                                    # bias broadcast (VPU)
    o_ref[...] = acc.astype(o_ref.dtype)


def _pick_row_tile(OH, OWC, vmem_budget_bytes=4 << 20):
    """Largest multiple-of-8 divisor of OH whose (double-buffered, f32) output
    tile fits the VMEM budget; falls back to the full height OH (always a
    legal block shape).  Bigger tiles = fewer grid steps and fewer re-DMAs of
    the per-sample input block."""
    max_th = vmem_budget_bytes // max(1, OWC * 4 * 2)   # x2 for double buffering
    max_th = max(8, min(OH, max_th))
    th = (max_th // 8) * 8
    while th >= 8:
        if OH % th == 0:
            return th
        th -= 8
    return OH


def cnn_layer_2d_plain(x_nchw, weight_oihw, bias, *, stride=1, dilation=1):
    """Forward pass of CNNLayer2dPlain. x_nchw: [N, Cin, H, W] (PyTorch layout)."""
    N, Cin, H, W = x_nchw.shape
    Cout, Cin_w, KH, KW = weight_oihw.shape
    assert Cin_w == Cin

    pad_h = dilation * (KH - 1) // 2
    pad_w = dilation * (KW - 1) // 2
    # Reflect padding requires pad < spatial extent (same constraint as PyTorch).
    assert pad_h < H and pad_w < W, "reflect pad requires pad < spatial size"

    # --- wrapper glue: NCHW -> NHWC + reflect pad (single layout pass), then
    # flatten (W, C) so the kernel's lane axis is Wp*Cin, not Cin. ---
    x = jnp.transpose(x_nchw, (0, 2, 3, 1))
    x = jnp.pad(x, ((0, 0), (pad_h, pad_h), (pad_w, pad_w), (0, 0)), mode="reflect")
    Hp, Wp = H + 2 * pad_h, W + 2 * pad_w
    OH = (Hp - dilation * (KH - 1) - 1) // stride + 1
    OW = (Wp - dilation * (KW - 1) - 1) // stride + 1
    x_flat = x.reshape(N, Hp, Wp * Cin)

    # --- expand weights over the output-width axis: fold (kw, ci) into the GEMM
    # contraction (Wp*Cin) and (ow, co) into the GEMM N dim (OW*Cout). ---
    w_hwio = jnp.transpose(weight_oihw, (2, 3, 1, 0)).astype(jnp.float32)  # (KH,KW,Cin,Cout)
    iw = jnp.arange(Wp)
    ow = jnp.arange(OW)
    kw = jnp.arange(KW)
    sel = (iw[None, :, None] == ow[None, None, :] * stride
           + kw[:, None, None] * dilation).astype(jnp.float32)            # (KW,Wp,OW)
    w_exp = jnp.einsum("kio,hkcd->hicod", sel, w_hwio)                     # (KH,Wp,Cin,OW,Cout)
    w_exp = w_exp.reshape(KH, Wp * Cin, OW * Cout)
    b_row = jnp.tile(bias.astype(jnp.float32), OW).reshape(1, OW * Cout)

    OWC = OW * Cout
    TH = _pick_row_tile(OH, OWC)
    n_t = OH // TH

    kernel = functools.partial(
        _conv2d_bias_kernel,
        TH=TH, KH=KH, stride=stride, dilation=dilation,
        wp_cin=Wp * Cin, n_t=n_t,
    )

    out_flat = pl.pallas_call(
        kernel,
        out_shape=jax.ShapeDtypeStruct((N, OH, OWC), x_nchw.dtype),
        grid=(N, n_t),
        in_specs=[
            pl.BlockSpec((None, Hp, Wp * Cin), lambda n, t: (n, 0, 0)),
            pl.BlockSpec((KH, Wp * Cin, OWC), lambda n, t: (0, 0, 0)),
            pl.BlockSpec((1, OWC), lambda n, t: (0, 0)),
        ],
        out_specs=pl.BlockSpec((None, TH, OWC), lambda n, t: (n, t, 0)),
        compiler_params=pltpu.CompilerParams(
            dimension_semantics=("parallel", "parallel")),
    )(x_flat, w_exp, b_row)

    # (N, OH, OW*Cout) -> NCHW to match the PyTorch module's output layout.
    out = out_flat.reshape(N, OH, OW, Cout)
    return jnp.transpose(out, (0, 3, 1, 2))


def _reference_forward(x_nchw, weight_oihw, bias, *, stride=1, dilation=1):
    """Pure-JAX reference replicating the PyTorch forward (for validation)."""
    _, _, KH, KW = weight_oihw.shape
    pad_h = dilation * (KH - 1) // 2
    pad_w = dilation * (KW - 1) // 2
    xp = jnp.pad(x_nchw, ((0, 0), (0, 0), (pad_h, pad_h), (pad_w, pad_w)),
                 mode="reflect")
    y = lax.conv_general_dilated(
        xp, weight_oihw,
        window_strides=(stride, stride),
        padding="VALID",
        rhs_dilation=(dilation, dilation),
        dimension_numbers=("NCHW", "OIHW", "NCHW"),
    )
    return y + bias.reshape(1, -1, 1, 1)


if __name__ == "__main__":
    # Module config (CNNLayer2dPlain(in_channels=4, out_channels=8,
    # kernel_size=(3, 3), stride=1, dilation=1)).
    N, Cin, H, W = 2, 4, 16, 16
    Cout, KH, KW = 8, 3, 3
    stride, dilation = 1, 1

    key = jax.random.PRNGKey(0)
    kx, kw_key = jax.random.split(key)

    x = jax.random.normal(kx, (N, Cin, H, W), dtype=jnp.float32)

    # Xavier (Glorot) uniform init, same as nn.init.xavier_uniform_ on OIHW weights.
    fan_in = Cin * KH * KW
    fan_out = Cout * KH * KW
    bound = math.sqrt(6.0 / (fan_in + fan_out))
    weight = jax.random.uniform(kw_key, (Cout, Cin, KH, KW),
                                minval=-bound, maxval=bound, dtype=jnp.float32)
    # bias_variable default init_bias=0.0
    bias = jnp.full((Cout,), 0.0, dtype=jnp.float32)

    out = cnn_layer_2d_plain(x, weight, bias, stride=stride, dilation=dilation)
    out = jax.block_until_ready(out)

    ref = _reference_forward(x, weight, bias, stride=stride, dilation=dilation)
    assert out.shape == ref.shape == (N, Cout, H, W), (out.shape, ref.shape)
    assert jnp.allclose(out, ref, atol=1e-4, rtol=1e-4), float(
        jnp.max(jnp.abs(out - ref)))

    print("KERNEL_OK")
</pallas_src>

<mosaic_0001>
module attributes {stable_mosaic.version = 11 : i64} {
  func.func @_conv2d_bias_kernel(%arg0: i32, %arg1: i32, %arg2: memref<1x18x72xf32, #tpu.memory_space<vmem>>, %arg3: memref<3x72x128xf32, #tpu.memory_space<vmem>>, %arg4: memref<1x128xf32, #tpu.memory_space<vmem>>, %arg5: memref<1x16x128xf32, #tpu.memory_space<vmem>>) attributes {dimension_semantics = [#tpu.dimension_semantics<parallel>, #tpu.dimension_semantics<parallel>], iteration_bounds = array<i64: 2, 1>, scalar_prefetch = 0 : i64, scratch_operands = 0 : i64, tpu.core_type = #tpu.core_type<tc>, window_params = [{transform_indices = @transform_0, window_bounds = array<i64: 1, 18, 72>}, {pipeline_mode = #tpu.pipeline_mode<synchronous>, transform_indices = @transform_1, window_bounds = array<i64: 3, 72, 128>}, {pipeline_mode = #tpu.pipeline_mode<synchronous>, transform_indices = @transform_2, window_bounds = array<i64: 1, 128>}, {transform_indices = @transform_3, window_bounds = array<i64: 1, 16, 128>}]} {
    %c0 = arith.constant 0 : index
    %c0_0 = arith.constant 0 : index
    %c0_1 = arith.constant 0 : index
    %0 = vector.load %arg2[%c0, %c0_0, %c0_1] : memref<1x18x72xf32, #tpu.memory_space<vmem>>, vector<1x18x72xf32>
    %1 = vector.shape_cast %0 : vector<1x18x72xf32> to vector<18x72xf32>
    %2 = vector.extract_strided_slice %1 {offsets = [0, 0], sizes = [16, 72], strides = [1, 1]} : vector<18x72xf32> to vector<16x72xf32>
    %c0_2 = arith.constant 0 : index
    %c0_3 = arith.constant 0 : index
    %c0_4 = arith.constant 0 : index
    %3 = vector.load %arg3[%c0_2, %c0_3, %c0_4] : memref<3x72x128xf32, #tpu.memory_space<vmem>>, vector<1x72x128xf32>
    %4 = vector.shape_cast %3 : vector<1x72x128xf32> to vector<72x128xf32>
    %cst = arith.constant dense<0.000000e+00> : vector<16x128xf32>
    %5 = tpu.matmul %2, %4, %cst {dimension_numbers = #tpu.dot_dimension_numbers<[1], [0], [0], [1], [0, 0, 1, 1], [], []>} : vector<16x72xf32>, vector<72x128xf32>, vector<16x128xf32> -> vector<16x128xf32>
    %6 = vector.extract_strided_slice %1 {offsets = [1, 0], sizes = [16, 72], strides = [1, 1]} : vector<18x72xf32> to vector<16x72xf32>
    %c1 = arith.constant 1 : index
    %c0_5 = arith.constant 0 : index
    %c0_6 = arith.constant 0 : index
    %7 = vector.load %arg3[%c1, %c0_5, %c0_6] : memref<3x72x128xf32, #tpu.memory_space<vmem>>, vector<1x72x128xf32>
    %8 = vector.shape_cast %7 : vector<1x72x128xf32> to vector<72x128xf32>
    %cst_7 = arith.constant dense<0.000000e+00> : vector<16x128xf32>
    %9 = tpu.matmul %6, %8, %cst_7 {dimension_numbers = #tpu.dot_dimension_numbers<[1], [0], [0], [1], [0, 0, 1, 1], [], []>} : vector<16x72xf32>, vector<72x128xf32>, vector<16x128xf32> -> vector<16x128xf32>
    %10 = arith.addf %5, %9 : vector<16x128xf32>
    %11 = vector.extract_strided_slice %1 {offsets = [2, 0], sizes = [16, 72], strides = [1, 1]} : vector<18x72xf32> to vector<16x72xf32>
    %c2 = arith.constant 2 : index
    %c0_8 = arith.constant 0 : index
    %c0_9 = arith.constant 0 : index
    %12 = vector.load %arg3[%c2, %c0_8, %c0_9] : memref<3x72x128xf32, #tpu.memory_space<vmem>>, vector<1x72x128xf32>
    %13 = vector.shape_cast %12 : vector<1x72x128xf32> to vector<72x128xf32>
    %cst_10 = arith.constant dense<0.000000e+00> : vector<16x128xf32>
    %14 = tpu.matmul %11, %13, %cst_10 {dimension_numbers = #tpu.dot_dimension_numbers<[1], [0], [0], [1], [0, 0, 1, 1], [], []>} : vector<16x72xf32>, vector<72x128xf32>, vector<16x128xf32> -> vector<16x128xf32>
    %15 = arith.addf %10, %14 : vector<16x128xf32>
    %c0_11 = arith.constant 0 : index
    %c0_12 = arith.constant 0 : index
    %16 = vector.load %arg4[%c0_11, %c0_12] : memref<1x128xf32, #tpu.memory_space<vmem>>, vector<1x128xf32>
    %17 = vector.broadcast %16 : vector<1x128xf32> to vector<16x128xf32>
    %18 = arith.addf %15, %17 : vector<16x128xf32>
    %c0_13 = arith.constant 0 : index
    %c0_14 = arith.constant 0 : index
    %c0_15 = arith.constant 0 : index
    %19 = vector.load %arg5[%c0_13, %c0_14, %c0_15] : memref<1x16x128xf32, #tpu.memory_space<vmem>>, vector<1x16x128xf32>
    %20 = vector.shape_cast %19 : vector<1x16x128xf32> to vector<16x128xf32>
    %21 = vector.shape_cast %18 : vector<16x128xf32> to vector<1x16x128xf32>
    tpu.vector_store %arg5[%c0_13, %c0_14, %c0_15], %21 {strides = array<i32>} : memref<1x16x128xf32, #tpu.memory_space<vmem>>, vector<1x16x128xf32>,
    return
  }
  func.func @transform_0(%arg0: i32, %arg1: i32) -> (i32, i32, i32) {
    %c0_i32 = arith.constant 0 : i32
    %c0_i32_0 = arith.constant 0 : i32
    %c0_i32_1 = arith.constant 0 : i32
    return %arg0, %c0_i32, %c0_i32_0 : i32, i32, i32
  }
  func.func @transform_1(%arg0: i32, %arg1: i32) -> (i32, i32, i32) {
    %c0_i32 = arith.constant 0 : i32
    %c0_i32_0 = arith.constant 0 : i32
    %c0_i32_1 = arith.constant 0 : i32
    %c0_i32_2 = arith.constant 0 : i32
    return %c0_i32, %c0_i32_0, %c0_i32_1 : i32, i32, i32
  }
  func.func @transform_2(%arg0: i32, %arg1: i32) -> (i32, i32) {
    %c0_i32 = arith.constant 0 : i32
    %c0_i32_0 = arith.constant 0 : i32
    %c0_i32_1 = arith.constant 0 : i32
    return %c0_i32, %c0_i32_0 : i32, i32
  }
  func.func @transform_3(%arg0: i32, %arg1: i32) -> (i32, i32, i32) {
    %c0_i32 = arith.constant 0 : i32
    %c0_i32_0 = arith.constant 0 : i32
    return %arg0, %arg1, %c0_i32 : i32, i32, i32
  }
}

</mosaic_0001>

<bundles_post_ra>
// kernel: tpu_custom_call.1
= control target key start
LH: loop header
LB: loop body
LE: loop exit
PB: predicated region body
PF: predicated region fallthrough
CT: control target
= control target key end

     0   :  { %8 = vsyncpa [#allocation3], 0  ;;  %s1153_s0 = inlined_call_operand.vmem [shape: f32[2,18,72], index: 0, kind: input, shape index: {}]   ;;  %s1154_s1 = inlined_call_operand.hbm [shape: f32[3,72,128], index: 1, kind: input, shape index: {}]   ;;  %s1155_s2 = inlined_call_operand.vmem [shape: f32[1,128], index: 2, kind: input, shape index: {}]   ;;  %s1156_s3 = inlined_call_operand.hbm [shape: f32[2,16,128], index: 3, kind: output, shape index: {}]  }
   0x1   :  { %9 = vsyncpa [#allocation4], 0 }
   0x2   :  { %11 = vsyncpa [#allocation4 + $0x1], 0  ;;  %s977_s12 = smov 0   ;;  %s979_s13 = smov 0  }
   0x3   :  { %s981_s14 = smov 0   ;;  %s983_s15 = smov 0  }
   0x4   :  { %s985_s16 = smov 0   ;;  %s987_s17 = smov 0  }
   0x5 LB: > { %s598_s18 = sadd.s32 4294967295, %s949_s17   ;;  %s599_s19 = sadd.s32 4294967294, %s949_s17   ;;  %s949_s17 = sphi %s987_s17, %s17_s17   ;;  %s945_s16 = sphi %s985_s16, %s1174_s16   ;;  %s941_s15 = sphi %s983_s15, %s1173_s15   ;;  %s937_s14 = sphi %s981_s14, %s1172_s14   ;;  %s933_s13 = sphi %s979_s13, %s1171_s13   ;;  %s929_s12 = sphi %s977_s12, %s1170_s12  }
   0x6   : > { %s29_s20 = sadd.s32 1, %s945_s16  ;;  %s106_s21 = sadd.s32 1, %s937_s14 }
   0x7   : > { %p31_p0 = scmp.ge.s32.totalorder %s29_s20, 2  ;;  %p116_p1 = scmp.ne.s32.totalorder %s937_s14, %s933_s13 }
   0x8   : > { %p117_p2 = scmp.eq.s32.totalorder %s598_s18, 1  ;;  %p122_p3 = scmp.ne.s32.totalorder %s933_s13, %s929_s12 }
   0x9   : > { %s1176_s20 = smov (%p31_p0, %s29_s20), 0  ;;  %p123_p5 = scmp.eq.s32.totalorder %s599_s19, 1 }
   0xa   : > { %p1017_p4 = por %p117_p2, %p116_p1  ;;  %s101_s23 = ssub.s32 %s945_s16, %s1176_s20 }
   0xb   : > { %p600_p6 = scmp.ge.s32.totalorder %s949_s17, 1  ;;  %p104_p7 = scmp.eq.s32.totalorder %s101_s23, 0 }
   0xc   : > { %s1161_s22 = scalar_select %p1017_p4, 1, 0 }
   0xd   : > { %p1024_p8 = por %p123_p5, %p122_p3  ;;  %p130_p9 = scmp.lt.s32.totalorder %s949_s17, 3 }
   0xe   : > { %s1030_s25 = scalar_select %p104_p7, %s937_s14, %s106_s21  }
   0xf   : > { %s1162_s24 = scalar_select %p1024_p8, 1, 0 }
  0x10   : > { %p1032_p10 = pnand %p600_p6, %p130_p9  ;;  %p1036_p11 = scmp.eq.s32.totalorder %s598_s18, 0 }
  0x11   : > { %s951_s28 = smov [#allocation2]   ;;  %s839_s6 = scalar_lea.hbm %s1154_s1, 3456 }
  0x12   : > { %s1163_s26 = scalar_select %p1032_p10, 1, 0 }
  0x13   : > { %s1164_s27 = scalar_select %p1036_p11, 1, 0 }
  0x14   : > { %p775_p12 = pneg %p1032_p10  ;;  %s142_s29 = sshll.u32 %s951_s28, 4  ;;  %s143_s29 = int_to_ptr.vmem [resolvable:$true] %s142_s29 }
  0x15   : > { %p840_p0 = scmp.ne.s32.totalorder %s1154_s1, %s839_s6  ;;  %p846_p5 = scmp.lt.u32.totalorder %s839_s6, %s1154_s1 }
  0x16   : > { %p1044_p13 = pnand %p1036_p11, %p775_p12 }
  0x18   : > { %p841_p1 = pneg %p1044_p13 }
  0x1a   : > { %p842_p2 = pnand %p841_p1, %p840_p0 }
  0x1c   : > { %p843_p3 = pneg %p842_p2 }
  0x1e   : > { %p848_p6 = pnand %p846_p5, %p843_p3 }
  0x20   : > { %851 = shalt.err (!%p848_p6)
}
  0x21   : > { %s852_s11 = scalar_lea.vmem %s143_s29, 3456  ;;  %p860_p8 = scmp.lt.s32.totalorder %s143_s29, %s143_s29 }
  0x22   : > { %p853_p7 = scmp.ne.s32.totalorder %s143_s29, %s852_s11  ;;  %p861_p4 = scmp.lt.s32.totalorder %s852_s11, %s852_s11 }
  0x24   : > { %p855_p9 = pnand %p853_p7, %p841_p1  ;;  %p862_p11 = por %p861_p4, %p860_p8 }
  0x26   : > { %p856_p12 = pneg %p855_p9 }
  0x28   : > { %p863_p10 = pnand %p862_p11, %p856_p12 }
  0x2a   : > { %866 = shalt.err (!%p863_p10)
}
  0x2b   : > { %s952_s18 = smov 128   ;;  %s953_s19 = smov 8  }
  0x2c   : > { %778 = dma.hbm_to_vmem [thread:$0]  (!%p1044_p13), %s1154_s1, 3456, %s143_s29, [#allocation3], %s952_s18, %s952_s18, %s953_s19  }
  0x2d   : > { %p1166_p0 = scmp.ne.s32.totalorder %s1163_s26, 0 }
  0x2e   : > { %p1167_p2 = scmp.ne.s32.totalorder (!%p1166_p0), %s1164_s27, 0 }
  0x2f   : > { %169 = sbr.rel (%p1166_p0) target bundleno = 326 (0x146), region = 32 }
  0x36   : > { %920 = dma.done.wait (%p1167_p2), [#allocation3], 3456  }
  0x37   : > { %922 = vsyncadd (%p1167_p2), [#allocation3], 4294963840  ;;  %p193_p4 = scmp.lt.s32.totalorder %s941_s15, 1  ;;  %v202_v0 = vld [vmem:[#allocation2] sm:$0xff]  ;;  %v203_v1 = vld [vmem:[#allocation2 + $0x8] sm:$0xff]  ;;  %vm230_vm0 = vcmask 588800  }
  0x38   : > { %v204_v2 = vld [vmem:[#allocation2 + $0x10] sm:$0xff]  ;;  %v732_v3 = vpack.c.bf16 %v203_v1, %v202_v0  ;;  %v205_v4 = vld [vmem:[#allocation2 + $0x18] sm:$0xff]  ;;  %v206_v6 = vld [vmem:[#allocation2 + $0x20] sm:$0xff]  ;;  %vm224_vm1 = vcmask 1046528   ;;  %vm399_vm2 = vcmask 1045504   ;;  %s190_s26 = sand.u32 1, %s933_s13  }
  0x39   : > { %s194_s28 = scalar_select %p193_p4, %s941_s15, 1  ;;  %v736_v5 = vpack.c.bf16 %v205_v4, %v204_v2  ;;  %v207_v7 = vld [vmem:[#allocation2 + $0x28] sm:$0xff]  ;;  %v213_v9 = vld [vmem:[#allocation2 + $0x50] sm:$0xff]  ;;  %v214_v15 = vld [vmem:[#allocation2 + $0x58] sm:$0xff] }
  0x3a   : > { %733 = vmatprep.subr.bf16.mxu0 %v732_v3  ;;  %v212_v8 = vld [vmem:[#allocation2 + $0x48] sm:$0xff]  ;;  %v740_v13 = vpack.c.bf16 %v207_v7, %v206_v6  ;;  %v215_v16 = vld [vmem:[#allocation2 + $0x60] sm:$0xff]  ;;  %v208_v17 = vld [vmem:[#allocation2 + $0x30] sm:$0xff]  ;;  %s605_s27 = sshll.u32 %s190_s26, 4  ;;  %s619_s10 = sshll.u32 %s941_s15, 8 }
  0x3b   : > { %s768_s4 = smul.u32 24, %s194_s28  ;;  %735 = vmatpush3.bf16.msra.mxu0 %v732_v3  ;;  %v716_v11 = vpack.c.bf16 %v213_v9, %v212_v8  ;;  %v209_v18 = vld [vmem:[#allocation2 + $0x38] sm:$0xff]  ;;  %v720_v19 = vpack.c.bf16 %v215_v16, %v214_v15  ;;  %v216_v20 = vld [vmem:[#allocation2 + $0x68] sm:$0xff]  ;;  %v217_v22 = vld [vmem:[#allocation2 + $0x70] sm:$0xff]  ;;  %s192_s8 = scalar_lea.vmem [#allocation5], %s605_s27 }
  0x3c   : > { %737 = vmatprep.subr.bf16.mxu0 %v736_v5  ;;  %v724_v23 = vpack.c.bf16 %v217_v22, %v216_v20  ;;  %v744_v25 = vpack.c.bf16 %v209_v18, %v208_v17  ;;  %v218_v26 = vld [vmem:[#allocation2 + $0x78] sm:$0xff]  ;;  %v219_v27 = vld [vmem:[#allocation2 + $0x80] sm:$0xff]  ;;  %v390_v31 = vld [vmem:[#allocation2 + $0x90] sm:$0xff]  ;;  %s513_s9 = sshll.u32 %s192_s8, 4  ;;  %s1105_s19 = scalar_lea.hbm %s1156_s3, %s619_s10  ;;  %s1100_s9 = int_to_ptr.vmem [resolvable:$true] %s513_s9 }
  0x3d   : > { %s1075_s29 = scalar_lea.vmem %s1153_s0, %s768_s4  ;;  %717 = vmatprep.subr.bf16.mxu1 %v716_v11  ;;  %v728_v28 = vpack.c.bf16 %v219_v27, %v218_v26  ;;  %v210_v29 = vld [vmem:[#allocation2 + $0x40] sm:$0xff]  ;;  %v391_v32 = vld [vmem:[#allocation2 + $0x98] sm:$0xff]  ;;  %v393_v36 = vld [vmem:[#allocation2 + $0xa8] sm:$0xff]  ;;  %s1107_s21 = scalar_lea.sflag [#allocation4], %s190_s26 }
  0x3e   : > { %v199_v10 = vld [vmem:[%s1075_s29] sm:$0xff]  ;;  %v1080_v14 = vld [vmem:[%s1075_s29 + $0x8] sm:$0xff]  ;;  %719 = vmatpush3.bf16.msra.mxu1 %v716_v11  ;;  %v201_v30 = vld [vmem:[%s1075_s29 + $0x10] sm:$0x3]  ;;  %v748_v38 = vpack.c.bf16 %v391_v32, %v390_v31  ;;  %s867_s15 = scalar_lea.vmem %s1100_s9, 256  ;;  %p1168_p10 = scmp.ne.s32.totalorder %s1161_s22, 0 }
  0x3f   : > { %v225_v12 = vrot.slane %v199_v10, 1  ;;  %692 = vmatprep.mubr.msk.f32.mxu0 %vm230_vm0, %v199_v10  ;;  %v226_v21 = vrot.slane %v1080_v14, 1  ;;  %739 = vmatpush3.bf16.msra.mxu0 %v736_v5  ;;  %v400_v33 = vrot.slane %v199_v10, 2  ;;  %v401_v34 = vrot.slane %v1080_v14, 2  ;;  %v392_v35 = vld [vmem:[#allocation2 + $0xa0] sm:$0xff]  ;;  %v220_v39 = vld [vmem:[#allocation2 + $0x88] sm:$0xff]  ;;  %p868_p8 = scmp.ne.s32.totalorder %s1100_s9, %s867_s15 }
  0x40   : > { %721 = vmatprep.subr.bf16.mxu1 %v720_v19  ;;  %741 = vmatprep.subr.bf16.mxu0 %v740_v13  ;;  %v228_v37 = vrot.slane %v201_v30, 1  ;;  %v752_v40 = vpack.c.bf16 %v393_v36, %v392_v35  ;;  %v394_v42 = vld [vmem:[#allocation2 + $0xb0] sm:$0xff]  ;;  %v395_v43 = vld [vmem:[#allocation2 + $0xb8] sm:$0xff]  ;;  %v396_v46 = vld [vmem:[#allocation2 + $0xc0] sm:$0xff]  ;;  %v403_v49 = vrot.slane %v201_v30, 2  ;;  %s954_s23 = smov [#allocation5]  }
  0x41   : > { %v227_v24 = vsel %vm224_vm1, %v225_v12, %v226_v21  ;;  %v402_v41 = vsel %vm399_vm2, %v400_v33, %v401_v34  ;;  %v756_v45 = vpack.c.bf16 %v395_v43, %v394_v42  ;;  %v397_v47 = vld [vmem:[#allocation2 + $0xc8] sm:$0xff]  ;;  %v398_v50 = vld [vmem:[#allocation2 + $0xd0] sm:$0xff]  ;;  %p869_p11 = pnand %p868_p8, %p1168_p10  ;;  %s871_s28 = sshll.u32 %s954_s23, 4  ;;  %s872_s28 = int_to_ptr.vmem [resolvable:$false] %s871_s28 }
  0x42   : > { %671 = vmatprep.mubr.msk.f32.mxu1 %vm230_vm0, %v227_v24  ;;  %723 = vmatpush3.bf16.msra.mxu1 %v720_v19  ;;  %v229_v44 = vsel %vm224_vm1, %v226_v21, %v228_v37  ;;  %v760_v48 = vpack.c.bf16 %v397_v47, %v396_v46  ;;  %v404_v51 = vsel %vm399_vm2, %v401_v34, %v403_v49  ;;  %v613_v55 = vld [vmem:[%s1155_s2] ss:$0 sm:$0xff]  ;;  %s873_s4 = scalar_lea.vmem %s872_s28, 512  ;;  %p874_p1 = scmp.lt.s32.totalorder %s1100_s9, %s872_s28 }
  0x43   : > { %743 = vmatpush3.bf16.msra.mxu0 %v740_v13  ;;  %725 = vmatprep.subr.bf16.mxu1 %v724_v23  ;;  %p870_p13 = pneg %p869_p11  ;;  %p875_p3 = scmp.lt.s32.totalorder %s873_s4, %s867_s15 }
  0x44   : > { %745 = vmatprep.subr.bf16.mxu0 %v744_v25 }
  0x45   : > { %p876_p5 = por %p875_p3, %p874_p1 }
  0x46   : > { %727 = vmatpush3.bf16.msra.mxu1 %v724_v23 }
  0x47   : > { %747 = vmatpush3.bf16.msra.mxu0 %v744_v25  ;;  %729 = vmatprep.subr.bf16.mxu1 %v728_v28  ;;  %p877_p6 = pnand %p876_p5, %p870_p13 }
  0x48   : > { %690 = vmatprep.subr.mxu0 %v210_v29 }
  0x4a   : > { %731 = vmatpush3.bf16.msra.mxu1 %v728_v28 }
  0x4b   : > { %691 = vmatpush3.msra.mxu0 %v210_v29  ;;  %669 = vmatprep.subr.mxu1 %v220_v39 }
  0x4c   : > { %749 = vmatprep.subr.bf16.mxu0 %v748_v38  ;;  %693 = vmatmul.mubr.msk.f32.vlgmr.msra.gmra.mrb[0].mxu0 %vm230_vm0, %v1080_v14 }
  0x4d   : > { %751 = vmatpush3.bf16.msra.mxu0 %v748_v38  ;;  %713 = vmatprep.mubr.msk.f32.mxu0 %vm230_vm0, %v402_v41 }
  0x4e   : > { %753 = vmatprep.subr.bf16.mxu0 %v752_v40  ;;  %670 = vmatpush3.msra.mxu1 %v220_v39 }
  0x4f   : > { %672 = vmatmul.mubr.msk.f32.vlgmr.msra.gmra.mrb[0].mxu1 %vm230_vm0, %v229_v44 }
  0x51   : > { %755 = vmatpush3.bf16.msra.mxu0 %v752_v40 }
  0x52   : > { %757 = vmatprep.subr.bf16.mxu0 %v756_v45 }
  0x55   : > { %759 = vmatpush3.bf16.msra.mxu0 %v756_v45 }
  0x56   : > { %761 = vmatprep.subr.bf16.mxu0 %v760_v48 }
  0x59   : > { %763 = vmatpush3.bf16.msra.mxu0 %v760_v48 }
  0x5a   : > { %711 = vmatprep.subr.mxu0 %v398_v50 }
  0x5d   : > { %712 = vmatpush3.msra.mxu0 %v398_v50 }
  0x5e   : > { %714 = vmatmul.mubr.msk.f32.vlgmr.msra.gmra.mrb[0].mxu0 %vm230_vm0, %v404_v51 }
 0x122   : > { %v673_v52 = vpop.f32.mrb[0].mxu1 }
 0x123   : > { %v301_v53 = vpop.f32.mrb[1].mxu1 }
 0x131   : > { %v715_v54 = vpop.f32.mrb[0].mxu0 }
 0x132   : > { %v764_v56 = vadd.f32 %v715_v54, %v673_v52  ;;  %v475_v57 = vpop.f32.mrb[1].mxu0 }
 0x133   : > { %v765_v58 = vadd.f32 %v475_v57, %v301_v53 }
 0x134   : > { %v494_v59 = vadd.f32 %v764_v56, %v613_v55 }
 0x135   : > { %v493_v60 = vadd.f32 %v765_v58, %v613_v55 }
 0x136   : > { %496 = vst [vmem:[%s192_s8 + $0x8] sm:$0xff] %v494_v59 }
 0x137   : > { %495 = vst [vmem:[%s192_s8] sm:$0xff] %v493_v60 }
 0x138   : > { %880 = shalt.err (!%p877_p6)
}
 0x139   : > { %s881_s30 = scalar_lea.hbm %s1105_s19, 256  ;;  %s885_s26 = scalar_lea.hbm %s1156_s3, 512 }
 0x13a   : > { %p882_p7 = scmp.ne.s32.totalorder %s1105_s19, %s881_s30  ;;  %p886_p0 = scmp.lt.u32.totalorder %s1105_s19, %s1156_s3 }
 0x13b   : > { %p887_p2 = scmp.lt.u32.totalorder %s885_s26, %s881_s30  ;;  %p889_p8 = scmp.lt.u32.totalorder %s881_s30, %s1105_s19 }
 0x13c   : > { %p883_p9 = pnand %p882_p7, %p1168_p10 }
 0x13d   : > { %p888_p4 = por %p887_p2, %p886_p0 }
 0x13e   : > { %p884_p12 = pneg %p883_p9 }
 0x13f   : > { %p890_p11 = por %p889_p8, %p888_p4 }
 0x141   : > { %p891_p13 = pnand %p890_p11, %p884_p12 }
 0x143   : > { %894 = shalt.err (!%p891_p13)
}
 0x144   : > { %s955_s7 = smov 128   ;;  %s956_s8 = smov 8  }
 0x145   : > { %773 = dma.vmem_to_hbm [thread:$0]  (%p1168_p10), %s1100_s9, 256, %s1105_s19, %s1107_s21, %s955_s7, %s955_s7, %s956_s8  }
 0x146 PF: > { %p785_p1 = scmp.ge.s32.totalorder %s949_s17, 2  ;;  %s528_s10 = sand.u32 1, %s929_s12  }
 0x147   : > { %p1169_p3 = scmp.ne.s32.totalorder %s1162_s24, 0  ;;  %s529_s11 = scalar_lea.sflag [#allocation4], %s528_s10 }
 0x149   : > { %p780_p5 = pnand %p785_p1, %p1169_p3 }
 0x14b   : > { %924 = dma.done.wait (!%p780_p5), %s529_s11, 256  }
 0x14c   : > { %926 = vsyncadd (!%p780_p5), %s529_s11, 4294967040  ;;  %s17_s17 = sadd.s32 1, %s949_s17   ;;  %s1170_s12 = smov %s933_s13 }
 0x14d   : > { %p14_p6 = scmp.ge.s32.totalorder %s17_s17, 4   ;;  %s1171_s13 = smov %s937_s14 }
 0x14e   : > { %s1172_s14 = smov %s1030_s25  ;;  %s1173_s15 = smov %s945_s16 }
 0x14f   : > { %s1174_s16 = smov %s1176_s20  ;;  %16 = sbr.rel (!%p14_p6) target bundleno = 5 (0x5), region = 74 }
 0x156   :  { %534 = vsyncpa [#allocation3], 1 }
 0x157   :  { %536 = vsyncpa [#allocation3 + $0x1], 1 }
 0x158   :  { %537 = vsyncpa [#allocation4], 1 }
 0x159   :  { %539 = vsyncpa [#allocation4 + $0x1], 1 }

</bundles_post_ra>
